<compile_context>
chip_gen: v7x
topology: tpu7x:2x2x1
jax: 0.10.0
libtpu: 0.0.40
codegen_flags: <defaults>
</compile_context>

<pallas_src>
import numpy as np
import jax
import jax.numpy as jnp
from jax import lax
from jax.experimental import pallas as pl
from jax.experimental.pallas import tpu as pltpu


def _generator_net_kernel(s_ref,          # SMEM (1,)       : scale parameter s
                          x_ref,          # VMEM (U, D)     : stacked [A; B1; B2] unique rows
                          e_ref,          # VMEM (N, U)     : +1/-1 row-broadcast matrix
                          w1_ref, b1_ref,  # VMEM (D, 2D), (1, 2D)  AddInfo.fc
                          w2_ref, b2_ref,  # VMEM (2D, D), (1, D)   Generator.fc
                          w3_ref,          # VMEM (D, C)            GeneratorNet.fc (no bias)
                          rebuild_ref,     # VMEM (N, D)
                          score_ref):      # VMEM (N, C)
    def leaky(v):
        return jnp.where(v > 0, v, 0.2 * v)

    # AddInfo.fc + LeakyReLU(0.2) on the unique rows only
    # (single fused matmul for A, B1 and B2; W1 pushed to the MXU once).
    h = leaky(jnp.dot(x_ref[...], w1_ref[...],
                      preferred_element_type=jnp.float32) + b1_ref[...])      # (U, 2D)

    # Generator.fc pre-activation on the unique rows:
    #   add_info @ W2 == E @ (H @ W2)   (dropouts are identity in eval mode)
    hw2 = jnp.dot(h, w2_ref[...], preferred_element_type=jnp.float32)         # (U, D)

    # Row-broadcast to the ways*shot*gen expanded rows, add bias, LeakyReLU.
    g = leaky(jnp.dot(e_ref[...], hw2,
                      preferred_element_type=jnp.float32) + b2_ref[...])      # (N, D)

    # l2_norm_3D: x / sqrt(sum(x^2) + 1e-10)  -> single EUP rsqrt, no divide.
    inv = lax.rsqrt(jnp.sum(g * g, axis=-1, keepdims=True) + 1e-10)
    rebuild = g * inv
    rebuild_ref[...] = rebuild

    # score = fc(rebuild * s) == s * (rebuild @ W3)   (bias-free linear)
    score_ref[...] = jnp.dot(rebuild, w3_ref[...],
                             preferred_element_type=jnp.float32) * s_ref[0]


def generator_net_forward(B1, B2, A, params):
    """B1, B2: (gen, dim); A: (ways, shot, dim). Returns (A_rebuild, score)."""
    ways, shot, dim = A.shape
    gen_nums = B1.shape[0]
    num_classes = params["w3"].shape[1]
    WS = ways * shot                 # unique support rows
    U = WS + 2 * gen_nums            # unique rows fed to the fused W1 matmul
    N = WS * gen_nums                # fully expanded rows (ways*shot*gen)

    # Unique rows only -- no repeat/tile expansion materialized in HBM.
    X = jnp.concatenate([A.reshape(WS, dim), B1, B2],
                        axis=0).astype(jnp.float32)                           # (U, dim)

    # Constant +1/-1 row-broadcast matrix, built with numpy at trace time
    # (shapes are static), so it is a baked constant, not a runtime op:
    #   expanded row n = w*shot*gen + s*gen + g  picks
    #     +fa[w*shot + s]  +fb1[g]  -fb2[g]
    n = np.arange(N)
    E = np.zeros((N, U), np.float32)
    E[n, n // gen_nums] = 1.0
    E[n, WS + n % gen_nums] = 1.0
    E[n, WS + gen_nums + n % gen_nums] = -1.0
    E = jnp.asarray(E)

    vmem = pl.BlockSpec(memory_space=pltpu.MemorySpace.VMEM)
    smem = pl.BlockSpec(memory_space=pltpu.MemorySpace.SMEM)

    rebuild, score = pl.pallas_call(
        _generator_net_kernel,
        out_shape=(
            jax.ShapeDtypeStruct((N, dim), jnp.float32),
            jax.ShapeDtypeStruct((N, num_classes), jnp.float32),
        ),
        in_specs=[smem, vmem, vmem, vmem, vmem, vmem, vmem, vmem],
        out_specs=(vmem, vmem),
    )(
        params["s"], X, E,
        params["w1"], params["b1"],
        params["w2"], params["b2"],
        params["w3"],
    )

    # Leading-dim-only reshapes: metadata views for row-major arrays (free).
    return (rebuild.reshape(ways, shot * gen_nums, dim),
            score.reshape(ways, shot * gen_nums, num_classes))


def init_params(key, dim=32, num_classes=5):
    """Deterministic synthetic parameters (shapes match the PyTorch module).
    Weights are stored transposed (in_features, out_features) for x @ W."""
    k1, k2, k3, k4, k5 = jax.random.split(key, 5)
    scale1 = 1.0 / jnp.sqrt(dim)
    scale2 = 1.0 / jnp.sqrt(2 * dim)
    return {
        # AddInfo.fc : Linear(dim, 2*dim)
        "w1": (jax.random.uniform(k1, (dim, 2 * dim), jnp.float32, -1, 1) * scale1),
        "b1": (jax.random.uniform(k2, (1, 2 * dim), jnp.float32, -1, 1) * scale1),
        # Generator.fc : Linear(2*dim, dim)
        "w2": (jax.random.uniform(k3, (2 * dim, dim), jnp.float32, -1, 1) * scale2),
        "b2": (jax.random.uniform(k4, (1, dim), jnp.float32, -1, 1) * scale2),
        # GeneratorNet.fc : Linear(dim, num_classes, bias=False)
        "w3": (jax.random.uniform(k5, (dim, num_classes), jnp.float32, -1, 1) * scale1),
        # s parameter
        "s": jnp.array([10.0], dtype=jnp.float32),
    }


def _reference_forward(B1, B2, A, params):
    """Plain-JAX replica of the PyTorch module (expand-then-matmul order)."""
    ways, shot, dim = A.shape
    gen = B1.shape[0]
    C = params["w3"].shape[1]
    A_exp = jnp.repeat(A, gen, axis=1).reshape(-1, dim)
    B1_exp = jnp.tile(B1[None], (ways, shot, 1)).reshape(-1, dim)
    B2_exp = jnp.tile(B2[None], (ways, shot, 1)).reshape(-1, dim)

    def leaky(v):
        return jnp.where(v > 0, v, 0.2 * v)

    def f(x):
        return leaky(x @ params["w1"] + params["b1"])

    add_info = f(A_exp) + f(B1_exp) - f(B2_exp)
    g = leaky(add_info @ params["w2"] + params["b2"])
    rebuild = g / jnp.sqrt(jnp.sum(g * g, axis=-1, keepdims=True) + 1e-10)
    score = (rebuild * params["s"][0]) @ params["w3"]
    return (rebuild.reshape(ways, shot * gen, dim),
            score.reshape(ways, shot * gen, C))


if __name__ == "__main__":
    key = jax.random.PRNGKey(0)
    dim, num_classes = 32, 5
    ways, shot, gen = 2, 2, 4

    kp, ka, kb1, kb2 = jax.random.split(key, 4)
    params = init_params(kp, dim=dim, num_classes=num_classes)

    A = jax.random.normal(ka, (ways, shot, dim), jnp.float32)      # support features
    B1 = jax.random.normal(kb1, (gen, dim), jnp.float32)           # info features 1
    B2 = jax.random.normal(kb2, (gen, dim), jnp.float32)           # info features 2

    A_rebuild, score = jax.jit(generator_net_forward)(B1, B2, A, params)
    jax.block_until_ready((A_rebuild, score))

    assert A_rebuild.shape == (ways, shot * gen, dim)
    assert score.shape == (ways, shot * gen, num_classes)

    # rebuilt features must be L2-normalized
    norms = jnp.linalg.norm(A_rebuild, axis=-1)
    assert bool(jnp.all(jnp.abs(norms - 1.0) < 1e-3))

    # match the un-fused (PyTorch-order) reference computation
    ref_rebuild, ref_score = _reference_forward(B1, B2, A, params)
    assert bool(jnp.allclose(A_rebuild, ref_rebuild, atol=2e-3, rtol=2e-3))
    assert bool(jnp.allclose(score, ref_score, atol=2e-3, rtol=2e-3))

    print("KERNEL_OK")
</pallas_src>

<mosaic_0001>
module attributes {stable_mosaic.version = 11 : i64} {
  func.func @_generator_net_kernel(%arg0: memref<1xf32, #tpu.memory_space<smem>>, %arg1: memref<12x32xf32, #tpu.memory_space<vmem>>, %arg2: memref<16x12xf32, #tpu.memory_space<vmem>>, %arg3: memref<32x64xf32, #tpu.memory_space<vmem>>, %arg4: memref<1x64xf32, #tpu.memory_space<vmem>>, %arg5: memref<64x32xf32, #tpu.memory_space<vmem>>, %arg6: memref<1x32xf32, #tpu.memory_space<vmem>>, %arg7: memref<32x5xf32, #tpu.memory_space<vmem>>, %arg8: memref<16x32xf32, #tpu.memory_space<vmem>>, %arg9: memref<16x5xf32, #tpu.memory_space<vmem>>) attributes {dimension_semantics = [], scalar_prefetch = 0 : i64, scratch_operands = 0 : i64, tpu.core_type = #tpu.core_type<tc>} {
    %c0 = arith.constant 0 : index
    %c0_0 = arith.constant 0 : index
    %0 = vector.load %arg1[%c0, %c0_0] : memref<12x32xf32, #tpu.memory_space<vmem>>, vector<12x32xf32>
    %c0_1 = arith.constant 0 : index
    %c0_2 = arith.constant 0 : index
    %1 = vector.load %arg3[%c0_1, %c0_2] : memref<32x64xf32, #tpu.memory_space<vmem>>, vector<32x64xf32>
    %cst = arith.constant dense<0.000000e+00> : vector<12x64xf32>
    %2 = tpu.matmul %0, %1, %cst {dimension_numbers = #tpu.dot_dimension_numbers<[1], [0], [0], [1], [0, 0, 1, 1], [], []>} : vector<12x32xf32>, vector<32x64xf32>, vector<12x64xf32> -> vector<12x64xf32>
    %c0_3 = arith.constant 0 : index
    %c0_4 = arith.constant 0 : index
    %3 = vector.load %arg4[%c0_3, %c0_4] : memref<1x64xf32, #tpu.memory_space<vmem>>, vector<1x64xf32>
    %4 = vector.broadcast %3 : vector<1x64xf32> to vector<12x64xf32>
    %5 = arith.addf %2, %4 : vector<12x64xf32>
    %cst_5 = arith.constant 0.000000e+00 : f32
    %6 = vector.broadcast %cst_5 : f32 to vector<12x64xf32>
    %7 = arith.cmpf ogt, %5, %6 : vector<12x64xf32>
    %cst_6 = arith.constant 2.000000e-01 : f32
    %8 = vector.broadcast %cst_6 : f32 to vector<12x64xf32>
    %9 = arith.mulf %8, %5 : vector<12x64xf32>
    %10 = arith.select %7, %5, %9 : vector<12x64xi1>, vector<12x64xf32>
    %c0_7 = arith.constant 0 : index
    %c0_8 = arith.constant 0 : index
    %11 = vector.load %arg5[%c0_7, %c0_8] : memref<64x32xf32, #tpu.memory_space<vmem>>, vector<64x32xf32>
    %cst_9 = arith.constant dense<0.000000e+00> : vector<12x32xf32>
    %12 = tpu.matmul %10, %11, %cst_9 {dimension_numbers = #tpu.dot_dimension_numbers<[1], [0], [0], [1], [0, 0, 1, 1], [], []>} : vector<12x64xf32>, vector<64x32xf32>, vector<12x32xf32> -> vector<12x32xf32>
    %c0_10 = arith.constant 0 : index
    %c0_11 = arith.constant 0 : index
    %13 = vector.load %arg2[%c0_10, %c0_11] : memref<16x12xf32, #tpu.memory_space<vmem>>, vector<16x12xf32>
    %cst_12 = arith.constant dense<0.000000e+00> : vector<16x32xf32>
    %14 = tpu.matmul %13, %12, %cst_12 {dimension_numbers = #tpu.dot_dimension_numbers<[1], [0], [0], [1], [0, 0, 1, 1], [], []>} : vector<16x12xf32>, vector<12x32xf32>, vector<16x32xf32> -> vector<16x32xf32>
    %c0_13 = arith.constant 0 : index
    %c0_14 = arith.constant 0 : index
    %15 = vector.load %arg6[%c0_13, %c0_14] : memref<1x32xf32, #tpu.memory_space<vmem>>, vector<1x32xf32>
    %16 = vector.broadcast %15 : vector<1x32xf32> to vector<16x32xf32>
    %17 = arith.addf %14, %16 : vector<16x32xf32>
    %cst_15 = arith.constant 0.000000e+00 : f32
    %18 = vector.broadcast %cst_15 : f32 to vector<16x32xf32>
    %19 = arith.cmpf ogt, %17, %18 : vector<16x32xf32>
    %cst_16 = arith.constant 2.000000e-01 : f32
    %20 = vector.broadcast %cst_16 : f32 to vector<16x32xf32>
    %21 = arith.mulf %20, %17 : vector<16x32xf32>
    %22 = arith.select %19, %17, %21 : vector<16x32xi1>, vector<16x32xf32>
    %23 = arith.mulf %22, %22 : vector<16x32xf32>
    %cst_17 = arith.constant dense<0.000000e+00> : vector<16xf32>
    %24 = vector.multi_reduction <add>, %23, %cst_17 [1] : vector<16x32xf32> to vector<16xf32>
    %25 = vector.shape_cast %24 : vector<16xf32> to vector<16x1xf32>
    %cst_18 = arith.constant 1.000000e-10 : f32
    %26 = vector.broadcast %cst_18 : f32 to vector<16x1xf32>
    %27 = arith.addf %25, %26 : vector<16x1xf32>
    %28 = math.rsqrt %27 : vector<16x1xf32>
    %29 = vector.broadcast %28 : vector<16x1xf32> to vector<16x32xf32>
    %30 = arith.mulf %22, %29 : vector<16x32xf32>
    %c0_19 = arith.constant 0 : index
    %c0_20 = arith.constant 0 : index
    %31 = vector.load %arg8[%c0_19, %c0_20] : memref<16x32xf32, #tpu.memory_space<vmem>>, vector<16x32xf32>
    tpu.vector_store %arg8[%c0_19, %c0_20], %30 {strides = array<i32>} : memref<16x32xf32, #tpu.memory_space<vmem>>, vector<16x32xf32>,
    %c0_21 = arith.constant 0 : index
    %c0_22 = arith.constant 0 : index
    %32 = vector.load %arg7[%c0_21, %c0_22] : memref<32x5xf32, #tpu.memory_space<vmem>>, vector<32x5xf32>
    %cst_23 = arith.constant dense<0.000000e+00> : vector<16x5xf32>
    %33 = tpu.matmul %30, %32, %cst_23 {dimension_numbers = #tpu.dot_dimension_numbers<[1], [0], [0], [1], [0, 0, 1, 1], [], []>} : vector<16x32xf32>, vector<32x5xf32>, vector<16x5xf32> -> vector<16x5xf32>
    %c0_24 = arith.constant 0 : index
    %34 = memref.load %arg0[%c0_24] : memref<1xf32, #tpu.memory_space<smem>>
    %35 = vector.broadcast %34 : f32 to vector<16x5xf32>
    %36 = arith.mulf %33, %35 : vector<16x5xf32>
    %c0_25 = arith.constant 0 : index
    %c0_26 = arith.constant 0 : index
    %37 = vector.load %arg9[%c0_25, %c0_26] : memref<16x5xf32, #tpu.memory_space<vmem>>, vector<16x5xf32>
    tpu.vector_store %arg9[%c0_25, %c0_26], %36 {strides = array<i32>} : memref<16x5xf32, #tpu.memory_space<vmem>>, vector<16x5xf32>,
    return
  }
}

</mosaic_0001>

<bundles_post_ra>
// kernel: generator_net_forward.1
= control target key start
LH: loop header
LB: loop body
LE: loop exit
PB: predicated region body
PF: predicated region fallthrough
CT: control target
= control target key end

     0   :  { %vm46_vm0 = vcmask 261120   ;;  %s757_s0 = inlined_call_operand.<no memory space> [shape: f32[1], index: 0, kind: input, shape index: {}]   ;;  %s758_s1 = inlined_call_operand.vmem [shape: f32[12,32], index: 1, kind: input, shape index: {}]   ;;  %s759_s2 = inlined_call_operand.vmem [shape: f32[16,12], index: 2, kind: input, shape index: {}]   ;;  %s760_s3 = inlined_call_operand.vmem [shape: f32[32,64], index: 3, kind: input, shape index: {}]   ;;  %s761_s4 = inlined_call_operand.vmem [shape: f32[1,64], index: 4, kind: input, shape index: {}]   ;;  %s762_s5 = inlined_call_operand.vmem [shape: f32[64,32], index: 5, kind: input, shape index: {}]   ;;  %s763_s6 = inlined_call_operand.vmem [shape: f32[1,32], index: 6, kind: input, shape index: {}]   ;;  %s764_s7 = inlined_call_operand.vmem [shape: f32[32,5], index: 7, kind: input, shape index: {}]   ;;  %s765_s8 = inlined_call_operand.hbm [shape: f32[16,32], index: 8, kind: output, shape index: {0}]   ;;  %s766_s9 = inlined_call_operand.vmem [shape: f32[16,5], index: 9, kind: output, shape index: {1}]  }
   0x1   :  { %v35_v0 = vld [vmem:[%s760_s3] sm:$0xff]  ;;  %v36_v1 = vld [vmem:[%s760_s3 + $0x8] sm:$0xff]  ;;  %v37_v2 = vld [vmem:[%s760_s3 + $0x10] sm:$0xff] }
   0x2   :  { %v538_v3 = vpack.c.bf16 %v36_v1, %v35_v0  ;;  %v38_v4 = vld [vmem:[%s760_s3 + $0x18] sm:$0xff]  ;;  %v33_v5 = vld [vmem:[%s758_s1] sm:$0xff]  ;;  %v135_v8 = vld [vmem:[%s762_s5 + $0x8] sm:$0xff] }
   0x3   :  { %v542_v6 = vpack.c.bf16 %v38_v4, %v37_v2  ;;  %498 = vmatprep.mubr.msk.f32.mxu0 %vm46_vm0, %v33_v5  ;;  %v134_v7 = vld [vmem:[%s762_s5] sm:$0xff]  ;;  %v136_v9 = vld [vmem:[%s762_s5 + $0x10] sm:$0xff]  ;;  %v137_v11 = vld [vmem:[%s762_s5 + $0x18] sm:$0xff] }
   0x4   :  { %539 = vmatprep.subr.bf16.mxu0 %v538_v3  ;;  %v546_v10 = vpack.c.bf16 %v135_v8, %v134_v7 }
   0x5   :  { %16 = vsyncpa [#allocation4], 0  ;;  %541 = vmatpush3.bf16.msra.mxu0 %v538_v3  ;;  %v550_v12 = vpack.c.bf16 %v137_v11, %v136_v9  ;;  %v34_v13 = vld [vmem:[%s758_s1 + $0x8] sm:$0xf]  ;;  %v138_v14 = vld [vmem:[%s762_s5 + $0x20] sm:$0xff]  ;;  %vm142_vm3 = vcmask 523264  }
   0x6   :  { %543 = vmatprep.subr.bf16.mxu0 %v542_v6  ;;  %547 = vmatprep.subr.bf16.mxu1 %v546_v10  ;;  %v139_v15 = vld [vmem:[%s762_s5 + $0x28] sm:$0xff]  ;;  %v140_v17 = vld [vmem:[%s762_s5 + $0x30] sm:$0xff]  ;;  %v141_v18 = vld [vmem:[%s762_s5 + $0x38] sm:$0xff]  ;;  %vm233_vm4 = vcmask 97280   ;;  %vm240_vm5 = vcmask 1043456   ;;  %vm608_vm6 = vmmov 1  }
   0x7   :  { %549 = vmatpush3.bf16.msra.mxu1 %v546_v10  ;;  %v554_v16 = vpack.c.bf16 %v139_v15, %v138_v14  ;;  %v558_v19 = vpack.c.bf16 %v141_v18, %v140_v17  ;;  %v453_v20 = vld [vmem:[%s761_s4] ss:$0 sm:$0xff]  ;;  %vm563_vm7 = vmpackc.low %vm240_vm5, %vm608_vm6  ;;  %v225_v33 = vld [vmem:[%s759_s2 + $0x8] sm:$0xff] }
   0x8   :  { %551 = vmatprep.subr.bf16.mxu1 %v550_v12  ;;  %v224_v29 = vld [vmem:[%s759_s2] sm:$0xff]  ;;  %v342_v48 = vld [vmem:[%s764_s7 + $0x8] sm:$0xff]  ;;  %v343_v50 = vld [vmem:[%s764_s7 + $0x10] sm:$0xff] }
   0x9   :  { %545 = vmatpush3.bf16.msra.mxu0 %v542_v6  ;;  %v458_v34 = vld [vmem:[%s763_s6] ss:$0 sm:$0xff]  ;;  %v344_v51 = vld [vmem:[%s764_s7 + $0x18] sm:$0xff] }
   0xa   :  { %v341_v47 = vld [vmem:[%s764_s7] sm:$0xff]  ;;  %v572_v52 = vpack.c.bf16 %v344_v51, %v343_v50  ;;  %s609_s7 = smov [#allocation3]  }
   0xb   :  { %553 = vmatpush3.bf16.msra.mxu1 %v550_v12  ;;  %v568_v49 = vpack.c.bf16 %v342_v48, %v341_v47  ;;  %s438_s25 = sshll.u32 %s609_s7, 4  ;;  %s439_s25 = int_to_ptr.vmem [resolvable:$true] %s438_s25 }
   0xc   :  { %499 = vmatmul.mubr.msk.f32.vlgmr.msra.gmra.mrb[0].mxu0 %vm46_vm0, %v34_v13  ;;  %555 = vmatprep.subr.bf16.mxu1 %v554_v16  ;;  %s584_s26 = scalar_lea.vmem %s439_s25, 256  ;;  %p589_p1 = scmp.lt.s32.totalorder %s439_s25, %s439_s25 }
   0xd   :  { %524 = vmatprep.mubr.msk.f32.mxu0 %vm233_vm4, %v224_v29  ;;  %p585_p0 = scmp.ne.s32.totalorder %s439_s25, %s584_s26  ;;  %p590_p2 = scmp.lt.s32.totalorder %s584_s26, %s584_s26 }
   0xf   :  { %557 = vmatpush3.bf16.msra.mxu1 %v554_v16  ;;  %p591_p3 = por %p590_p2, %p589_p1 }
  0x10   :  { %559 = vmatprep.subr.bf16.mxu1 %v558_v19 }
  0x11   :  { %p592_p4 = pnand %p591_p3, %p585_p0 }
  0x13   :  { %561 = vmatpush3.bf16.msra.mxu1 %v558_v19 }
  0xdf   :  { %v500_v21 = vpop.f32.mrb[0].mxu0 }
  0xe0   :  { %v125_v22 = vadd.f32 %v500_v21, %v453_v20  ;;  %v119_v23 = vpop.f32.mrb[1].mxu0 }
  0xe1   :  { %v120_v24 = vadd.f32 %v453_v20, %v119_v23 }
  0xe2   :  { %v131_v25 = vmul.f32 0.2, %v125_v22  ;;  %vm129_vm1 = vcmp.gt.f32.partialorder %v125_v22, 0.0 }
  0xe3   :  { %vm128_vm2 = vcmp.gt.f32.partialorder %v120_v24, 0.0  ;;  %v130_v26 = vmul.f32 0.2, %v120_v24 }
  0xe4   :  { %v133_v28 = vsel %vm129_vm1, %v125_v22, %v131_v25 }
  0xe5   :  { %v132_v27 = vsel %vm128_vm2, %v120_v24, %v130_v26 }
  0xe6   :  { %517 = vmatprep.mubr.msk.f32.mxu1 %vm142_vm3, %v132_v27 }
  0xe7   :  { %518 = vmatmul.mubr.msk.f32.vlgmr.msra.gmra.mrb[0].mxu1 %vm142_vm3, %v133_v28 }
 0x1ba   :  { %v519_v30 = vpop.f32.mrb[0].mxu1 }
 0x1bb   :  { %v215_v31 = vpop.f32.mrb[1].mxu1 }
 0x1bc   :  { %v562_v32 = vpack.c.bf16 %v519_v30, %v215_v31 }
 0x1be   :  { %564 = vmatprep.subr.msk.bf16.mxu0 %vm563_vm7, %v562_v32 }
 0x1bf   :  { %567 = vmatpush3.bf16.msk.msra.mxu0 %vm563_vm7, %v562_v32 }
 0x1c0   :  { %569 = vmatprep.subr.bf16.mxu0 %v568_v49 }
 0x1c2   :  { %525 = vmatmul.mubr.msk.f32.vlgmr.msra.gmra.mrb[2].mxu0 %vm233_vm4, %v225_v33 }
 0x1c3   :  { %571 = vmatpush3.bf16.msra.mxu0 %v568_v49 }
 0x1c4   :  { %573 = vmatprep.subr.bf16.mxu0 %v572_v52 }
 0x1c7   :  { %575 = vmatpush3.bf16.msra.mxu0 %v572_v52 }
 0x295   :  { %v526_v35 = vpop.f32.mrb[2].mxu0 }
 0x296   :  { %v316_v36 = vadd.f32 %v526_v35, %v458_v34  ;;  %v310_v37 = vpop.f32.mrb[3].mxu0 }
 0x297   :  { %v311_v38 = vadd.f32 %v458_v34, %v310_v37 }
 0x298   :  { %vm320_vm8 = vcmp.gt.f32.partialorder %v316_v36, 0.0  ;;  %v322_v39 = vmul.f32 0.2, %v316_v36 }
 0x299   :  { %v321_v40 = vmul.f32 0.2, %v311_v38  ;;  %vm319_vm9 = vcmp.gt.f32.partialorder %v311_v38, 0.0 }
 0x29a   :  { %v324_v42 = vsel %vm320_vm8, %v316_v36, %v322_v39 }
 0x29b   :  { %v323_v41 = vsel %vm319_vm9, %v311_v38, %v321_v40  ;;  %v326_v45 = vmul.f32 %v324_v42, %v324_v42 }
 0x29c   :  { %v325_v43 = vmul.f32 %v323_v41, %v323_v41 }
 0x29d   :  { %v330_v46 = vsel %vm46_vm0, %v326_v45, 0.0 }
 0x29e   :  { %v327_v44 = vsel %vm46_vm0, %v325_v43, 0.0 }
 0x29f   :  { %328 = vadd.xlane.f32.xlu0 %v327_v44 }
 0x2a3   :  { %331 = vadd.xlane.f32.xlu0 %v330_v46 }
 0x32c   :  { %v329_v53 = vpop.xlane.xlu0 %328 }
 0x32d   :  { %v333_v54 = vadd.f32 1e-10, %v329_v53 }
 0x32f   :  { %580 = vrsqrt.f32 %v333_v54 }
 0x330   :  { %v332_v55 = vpop.xlane.xlu0 %331 }
 0x331   :  { %v334_v56 = vadd.f32 1e-10, %v332_v55 }
 0x333   :  { %582 = vrsqrt.f32 %v334_v56 }
 0x339   :  { %v581_v57 = vpop.eup %580 }
 0x33a   :  { %v337_v58 = vmul.f32 %v581_v57, %v323_v41 }
 0x33c   :  { %535 = vmatprep.mubr.msk.f32.mxu0 %vm46_vm0, %v337_v58  ;;  %339 = vst.msk [vmem:[#allocation3] sm:$0xff] %vm46_vm0, %v337_v58 }
 0x33d   :  { %v583_v59 = vpop.eup %582 }
 0x33e   :  { %v338_v60 = vmul.f32 %v583_v59, %v324_v42 }
 0x340   :  { %340 = vst.msk [vmem:[#allocation3 + $0x8] sm:$0xff] %vm46_vm0, %v338_v60  ;;  %536 = vmatmul.mubr.msk.f32.vlgmr.msra.gmra.mrb[4].mxu0 %vm46_vm0, %v338_v60 }
 0x341   :  { %595 = shalt.err (!%p592_p4)
}
 0x342   :  { %s596_s29 = scalar_lea.hbm %s765_s8, 256 }
 0x343   :  { %p597_p5 = scmp.ne.s32.totalorder %s765_s8, %s596_s29  ;;  %p600_p6 = scmp.lt.u32.totalorder %s596_s29, %s765_s8 }
 0x345   :  { %p602_p7 = pnand %p600_p6, %p597_p5 }
 0x347   :  { %605 = shalt.err (!%p602_p7)
}
 0x348   :  { %s610_s13 = smov 128   ;;  %s611_s1 = smov 8   ;;  %v427_v61 = vstv %s757_s0  ;;  %vm430_vm10 = vcmask 39936  }
 0x349   :  { %444 = dma.vmem_to_hbm [thread:$0]  %s439_s25, 256, %s765_s8, [#allocation4], %s610_s13, %s610_s13, %s611_s1  }
 0x413   :  { %v537_v62 = vpop.f32.mrb[4].mxu0 }
 0x414   :  { %v429_v63 = vmul.f32 %v537_v62, %v427_v61  ;;  %v417_v0 = vpop.f32.mrb[5].mxu0 }
 0x415   :  { %v428_v1 = vmul.f32 %v427_v61, %v417_v0 }
 0x416   :  { %432 = vst.msk [vmem:[%s766_s9 + $0x8] sm:$0xff] %vm430_vm10, %v429_v63 }
 0x417   :  { %431 = vst.msk [vmem:[%s766_s9] sm:$0xff] %vm430_vm10, %v428_v1 }
 0x418   :  { %606 = dma.done.wait [#allocation4], 256  }
 0x419   :  { %607 = vsyncadd [#allocation4], 4294967040 }
 0x41a   :  { %452 = vsyncpa [#allocation4], 1 }

</bundles_post_ra>
